<compile_context>
chip_gen: v6e
topology: v6e:2x2x1
jax: 0.10.0
libtpu: 0.0.40
codegen_flags: <defaults>
</compile_context>

<pallas_src>
import functools

import jax
import jax.numpy as jnp
from jax.experimental import pallas as pl
from jax.experimental.pallas import tpu as pltpu

_LANES = 512            # lane-dense last dim (multiple of 128)
_MAX_BLOCK_ROWS = 2048  # 2048 x 512 f32 tile = 4 MiB; 16 MiB with double buffering


def _act_kernel(x_ref, o_ref, *, is_last: bool):
    x = x_ref[...]
    if is_last:
        o_ref[...] = jnp.tanh(x)
    else:
        # LeakyReLU with PyTorch default negative_slope = 0.01
        o_ref[...] = jnp.maximum(x, jnp.asarray(0.01, x.dtype) * x)


def complex_activation(x, is_last: bool = False):
    """x: [B, C>=2, ...] -> [B, 2, ...], act applied elementwise to channels 0/1."""
    assert x.shape[1] >= 2, "dim 1 must hold at least (real, imag)"
    # Match PyTorch: only channels 0 and 1 are used / returned.
    x = x[:, :2, ...]
    orig_shape = x.shape
    dtype = x.dtype

    flat = x.reshape(-1)
    total = flat.shape[0]

    lanes = _LANES
    n_rows = pl.cdiv(total, lanes)
    n_rows8 = ((n_rows + 7) // 8) * 8            # sublane-aligned row count
    block_rows = min(_MAX_BLOCK_ROWS, n_rows8)   # big streaming tiles, shrink for small inputs
    n_rows_padded = ((n_rows8 + block_rows - 1) // block_rows) * block_rows
    padded_total = n_rows_padded * lanes

    if padded_total != total:
        flat = jnp.pad(flat, (0, padded_total - total))
    x2d = flat.reshape(n_rows_padded, lanes)

    kernel = functools.partial(_act_kernel, is_last=is_last)

    out2d = pl.pallas_call(
        kernel,
        out_shape=jax.ShapeDtypeStruct((n_rows_padded, lanes), dtype),
        grid_spec=pltpu.PrefetchScalarGridSpec(
            num_scalar_prefetch=0,
            grid=(n_rows_padded // block_rows,),
            in_specs=[pl.BlockSpec((block_rows, lanes), lambda i: (i, 0))],
            out_specs=pl.BlockSpec((block_rows, lanes), lambda i: (i, 0)),
        ),
        compiler_params=pltpu.CompilerParams(
            dimension_semantics=("parallel",),
        ),
    )(x2d)

    if padded_total != total:
        return out2d.reshape(-1)[:total].reshape(orig_shape)
    return out2d.reshape(orig_shape)


def _reference(x, is_last: bool):
    real = x[:, 0, ...]
    imag = x[:, 1, ...]
    if is_last:
        real = jnp.tanh(real)
        imag = jnp.tanh(imag)
    else:
        real = jnp.where(real >= 0, real, 0.01 * real)
        imag = jnp.where(imag >= 0, imag, 0.01 * imag)
    return jnp.stack((real, imag), axis=1)


if __name__ == "__main__":
    key = jax.random.PRNGKey(0)
    k1, k2, k3 = jax.random.split(key, 3)

    # [batch=2, complex=2, freq=16, time=16]
    x = jax.random.normal(k1, (2, 2, 16, 16), dtype=jnp.float32)
    # A second, non-aligned shape to exercise the pad/reshape path.
    y = jax.random.normal(k2, (2, 2, 8, 12), dtype=jnp.float32)
    # A third shape that exercises padding + multi-row tiles.
    z = jax.random.normal(k3, (2, 2, 64, 100), dtype=jnp.float32)

    # isLast=False path (LeakyReLU)
    out_lrelu = jax.block_until_ready(complex_activation(x, is_last=False))
    assert out_lrelu.shape == x.shape
    assert jnp.allclose(out_lrelu, _reference(x, is_last=False), atol=1e-5), \
        "LeakyReLU path mismatch"

    # isLast=True path (Tanh)
    out_tanh = jax.block_until_ready(complex_activation(x, is_last=True))
    assert jnp.allclose(out_tanh, _reference(x, is_last=True), atol=1e-5), \
        "Tanh path mismatch"

    # Padding / odd-shape path
    out_y = jax.block_until_ready(complex_activation(y, is_last=False))
    assert out_y.shape == y.shape
    assert jnp.allclose(out_y, _reference(y, is_last=False), atol=1e-5), \
        "Odd-shape LeakyReLU path mismatch"

    # Larger padded shape, both branches
    out_z = jax.block_until_ready(complex_activation(z, is_last=False))
    assert jnp.allclose(out_z, _reference(z, is_last=False), atol=1e-5), \
        "Large LeakyReLU path mismatch"
    out_z_t = jax.block_until_ready(complex_activation(z, is_last=True))
    assert jnp.allclose(out_z_t, _reference(z, is_last=True), atol=1e-5), \
        "Large Tanh path mismatch"

    print("KERNEL_OK")
</pallas_src>

<mosaic_0001>
module attributes {stable_mosaic.version = 11 : i64} {
  func.func @_act_kernel(%arg0: i32, %arg1: memref<8x512xf32, #tpu.memory_space<vmem>>, %arg2: memref<8x512xf32, #tpu.memory_space<vmem>>) attributes {dimension_semantics = [#tpu.dimension_semantics<parallel>], iteration_bounds = array<i64: 1>, scalar_prefetch = 0 : i64, scratch_operands = 0 : i64, tpu.core_type = #tpu.core_type<tc>, window_params = [{transform_indices = @transform_0, window_bounds = array<i64: 8, 512>}, {transform_indices = @transform_1, window_bounds = array<i64: 8, 512>}]} {
    %c0 = arith.constant 0 : index
    %c0_0 = arith.constant 0 : index
    %0 = vector.load %arg1[%c0, %c0_0] : memref<8x512xf32, #tpu.memory_space<vmem>>, vector<8x512xf32>
    %cst = arith.constant 0.00999999977 : f32
    %1 = vector.broadcast %cst : f32 to vector<8x512xf32>
    %2 = arith.mulf %1, %0 : vector<8x512xf32>
    %3 = arith.maximumf %0, %2 : vector<8x512xf32>
    %c0_1 = arith.constant 0 : index
    %c0_2 = arith.constant 0 : index
    %4 = vector.load %arg2[%c0_1, %c0_2] : memref<8x512xf32, #tpu.memory_space<vmem>>, vector<8x512xf32>
    tpu.vector_store %arg2[%c0_1, %c0_2], %3 {strides = array<i32>} : memref<8x512xf32, #tpu.memory_space<vmem>>, vector<8x512xf32>,
    return
  }
  func.func @transform_0(%arg0: i32) -> (i32, i32) {
    %c0_i32 = arith.constant 0 : i32
    %c0_i32_0 = arith.constant 0 : i32
    return %arg0, %c0_i32 : i32, i32
  }
  func.func @transform_1(%arg0: i32) -> (i32, i32) {
    %c0_i32 = arith.constant 0 : i32
    %c0_i32_0 = arith.constant 0 : i32
    return %arg0, %c0_i32 : i32, i32
  }
}

</mosaic_0001>

<bundles_post_ra>
// kernel: tpu_custom_call.1
= control target key start
LH: loop header
LB: loop body
LE: loop exit
PB: predicated region body
PF: predicated region fallthrough
CT: control target
= control target key end

     0   :  { %6 = vsyncpa [#allocation3], 0  ;;  %s116_s0 = inlined_call_operand.hbm [shape: f32[8,512], index: 0, kind: input, shape index: {}]   ;;  %s117_s1 = inlined_call_operand.hbm [shape: f32[8,512], index: 1, kind: output, shape index: {}]  }
   0x1   :  { %7 = vsyncpa [#allocation4], 0  ;;  %s98_s6 = smov [#allocation2]  }
   0x2   :  { %s14_s7 = sshll.u32 %s98_s6, 4  ;;  %s15_s7 = int_to_ptr.vmem [resolvable:$true] %s14_s7 }
   0x3   :  { %s62_s8 = scalar_lea.vmem %s15_s7, 512  ;;  %p67_p1 = scmp.lt.s32.totalorder %s15_s7, %s15_s7 }
   0x4   :  { %p63_p0 = scmp.ne.s32.totalorder %s15_s7, %s62_s8  ;;  %p68_p2 = scmp.lt.s32.totalorder %s62_s8, %s62_s8 }
   0x6   :  { %p69_p3 = por %p68_p2, %p67_p1 }
   0x8   :  { %p70_p4 = pnand %p69_p3, %p63_p0 }
   0xa   :  { %73 = shalt.err (!%p70_p4)
}
   0xb   :  { %17 = dma.hbm_to_vmem [thread:$0]  %s116_s0, 512, %s15_s7, [#allocation3]  }
   0xc   :  { %94 = dma.done.wait [#allocation3], 512  }
   0xd   :  { %95 = vsyncadd [#allocation3], 4294966784  ;;  %v21_v0 = vld [vmem:[#allocation2] sm:$0xff]  ;;  %v22_v1 = vld [vmem:[#allocation2 + $0x8] sm:$0xff]  ;;  %s99_s11 = smov [#allocation5]  }
   0xe   :  { %v23_v2 = vld [vmem:[#allocation2 + $0x10] sm:$0xff]  ;;  %v25_v3 = vmul.f32 0.01, %v21_v0  ;;  %v26_v4 = vmul.f32 0.01, %v22_v1  ;;  %v24_v6 = vld [vmem:[#allocation2 + $0x18] sm:$0xff] }
   0xf   :  { %v27_v5 = vmul.f32 0.01, %v23_v2  ;;  %s43_s12 = sshll.u32 %s99_s11, 4  ;;  %v28_v10 = vmul.f32 0.01, %v24_v6  ;;  %s44_s12 = int_to_ptr.vmem [resolvable:$true] %s43_s12 }
  0x10   :  { %v29_v7 = vmax.f32 %v21_v0, %v25_v3  ;;  %v30_v8 = vmax.f32 %v22_v1, %v26_v4  ;;  %s74_s0 = scalar_lea.vmem %s44_s12, 512  ;;  %p79_p6 = scmp.lt.s32.totalorder %s44_s12, %s44_s12 }
  0x11   :  { %v31_v9 = vmax.f32 %v23_v2, %v27_v5  ;;  %v32_v11 = vmax.f32 %v24_v6, %v28_v10  ;;  %p75_p5 = scmp.ne.s32.totalorder %s44_s12, %s74_s0  ;;  %p80_p7 = scmp.lt.s32.totalorder %s74_s0, %s74_s0 }
  0x12   :  { %33 = vst [vmem:[#allocation5] sm:$0xff] %v29_v7  ;;  %34 = vst [vmem:[#allocation5 + $0x8] sm:$0xff] %v30_v8 }
  0x13   :  { %35 = vst [vmem:[#allocation5 + $0x10] sm:$0xff] %v31_v9  ;;  %36 = vst [vmem:[#allocation5 + $0x18] sm:$0xff] %v32_v11  ;;  %p81_p8 = por %p80_p7, %p79_p6 }
  0x15   :  { %p82_p9 = pnand %p81_p8, %p75_p5 }
  0x17   :  { %85 = shalt.err (!%p82_p9)
}
  0x18   :  { %46 = dma.vmem_to_hbm [thread:$0]  %s44_s12, 512, %s117_s1, [#allocation4]  }
  0x19   :  { %96 = dma.done.wait [#allocation4], 512  }
  0x1a   :  { %97 = vsyncadd [#allocation4], 4294966784 }
  0x1b   :  { %50 = vsyncpa [#allocation3], 1 }
  0x1c   :  { %51 = vsyncpa [#allocation4], 1 }

</bundles_post_ra>
